<compile_context>
chip_gen: v7x
topology: tpu7x:2x2x1
jax: 0.10.0
libtpu: 0.0.40
codegen_flags: <defaults>
</compile_context>

<pallas_src>
import functools

import jax
import jax.numpy as jnp
from jax import lax
from jax.experimental import pallas as pl
from jax.experimental.pallas import tpu as pltpu

EPS = 1e-5
_DEFAULT_BLOCK_F32_BYTES = 4 * 1024 * 1024  # f32-equivalent footprint of one x block


def _round_up(a, m):
    return ((a + m - 1) // m) * m


def _sublane_multiple(dtype):
    # f32 -> 8, bf16 -> 16, int8/fp8 -> 32 (sublane packing)
    return max(8, 32 // jnp.dtype(dtype).itemsize)


def _vmem_limit_bytes():
    # ~3/4 of physical VMEM: ~48 MiB on v7x (64 MiB/TC), 96 MiB on v5e/v6e.
    try:
        cap = int(pltpu.get_tpu_info().vmem_capacity_bytes)
    except Exception:
        cap = 64 * 1024 * 1024  # conservative fallback (v7x-sized)
    return int(min(cap * 3 // 4, 96 * 1024 * 1024))


def _row_tile(rows, hw_block, mult, block_f32_bytes):
    """Row tile: multiple of `mult`, bounded by an f32-equivalent byte budget."""
    r = max(mult, (block_f32_bytes // (4 * hw_block)) // mult * mult)
    if rows >= 2 * mult:  # ensure >= 2 grid steps when possible (v7x: 2 TensorCores)
        r = min(r, _round_up(pl.cdiv(rows, 2), mult))
    if r >= rows:         # full-extent block dim is always legal
        r = rows
    return r


# ---------------------------------------------------------------------------
# Single-pass kernel: whole spatial extent of a row tile fits in one block.
# ---------------------------------------------------------------------------
def _in_rows_kernel(x_ref, o_ref, *, inv_hw):
    # x_ref: (R, HW) block; one independent instance-norm row per sublane row.
    x = x_ref[...].astype(jnp.float32)
    s = jnp.sum(x, axis=-1, keepdims=True)
    ss = jnp.sum(x * x, axis=-1, keepdims=True)
    mean = s * inv_hw
    var = jnp.maximum(ss * inv_hw - mean * mean, 0.0)  # biased var, f32 accumulation
    inv_std = lax.rsqrt(var + EPS)
    o_ref[...] = ((x - mean) * inv_std).astype(o_ref.dtype)


def _single_pass(x2, rows, hw, mult, block_f32_bytes, vmem_limit):
    r = _row_tile(rows, hw, mult, block_f32_bytes)
    itemsize = x2.dtype.itemsize
    return pl.pallas_call(
        functools.partial(_in_rows_kernel, inv_hw=1.0 / hw),
        out_shape=jax.ShapeDtypeStruct((rows, hw), x2.dtype),
        grid_spec=pltpu.PrefetchScalarGridSpec(
            num_scalar_prefetch=0,
            grid=(pl.cdiv(rows, r),),
            in_specs=[pl.BlockSpec((r, hw), lambda i: (i, 0))],
            out_specs=pl.BlockSpec((r, hw), lambda i: (i, 0)),
        ),
        compiler_params=pltpu.CompilerParams(
            dimension_semantics=("parallel",),
            vmem_limit_bytes=vmem_limit,
        ),
        cost_estimate=pl.CostEstimate(
            flops=5 * rows * hw,
            transcendentals=rows,
            bytes_accessed=2 * rows * hw * itemsize,
        ),
    )(x2)


# ---------------------------------------------------------------------------
# Two-pass fallback for very large HW: accumulate sum / sum_sq over an
# 'arbitrary' HW grid axis, then normalize in a second pass.
# ---------------------------------------------------------------------------
def _in_stats_kernel(x_ref, mean_ref, istd_ref, sum_ref, sq_ref, *, hw_total, hw_block):
    j = pl.program_id(1)

    @pl.when(j == 0)
    def _init():
        sum_ref[...] = jnp.zeros_like(sum_ref)
        sq_ref[...] = jnp.zeros_like(sq_ref)

    x = x_ref[...].astype(jnp.float32)  # (R, THW)
    col = j * hw_block + lax.broadcasted_iota(jnp.int32, x.shape, 1)
    x = jnp.where(col < hw_total, x, 0.0)  # mask the padded tail of HW
    sum_ref[...] += jnp.sum(x, axis=-1, keepdims=True)
    sq_ref[...] += jnp.sum(x * x, axis=-1, keepdims=True)

    @pl.when(j == pl.num_programs(1) - 1)
    def _finalize():
        inv_hw = 1.0 / hw_total
        mean = sum_ref[...] * inv_hw
        var = jnp.maximum(sq_ref[...] * inv_hw - mean * mean, 0.0)
        mean_ref[...] = mean
        istd_ref[...] = lax.rsqrt(var + EPS)


def _in_apply_kernel(x_ref, mean_ref, istd_ref, o_ref):
    x = x_ref[...].astype(jnp.float32)
    o_ref[...] = ((x - mean_ref[...]) * istd_ref[...]).astype(o_ref.dtype)


def _two_pass(x2, rows, hw, mult, block_f32_bytes, vmem_limit):
    itemsize = x2.dtype.itemsize
    thw_cap = max(128, (block_f32_bytes // (4 * mult)) // 128 * 128)
    thw = hw if hw <= 128 else min(thw_cap, (hw // 128) * 128)
    r = _row_tile(rows, thw, mult, block_f32_bytes)
    num_i = pl.cdiv(rows, r)
    num_j = pl.cdiv(hw, thw)

    mean, inv_std = pl.pallas_call(
        functools.partial(_in_stats_kernel, hw_total=hw, hw_block=thw),
        out_shape=(jax.ShapeDtypeStruct((rows, 1), jnp.float32),
                   jax.ShapeDtypeStruct((rows, 1), jnp.float32)),
        grid_spec=pltpu.PrefetchScalarGridSpec(
            num_scalar_prefetch=0,
            grid=(num_i, num_j),
            in_specs=[pl.BlockSpec((r, thw), lambda i, j: (i, j))],
            out_specs=(pl.BlockSpec((r, 1), lambda i, j: (i, 0)),
                       pl.BlockSpec((r, 1), lambda i, j: (i, 0))),
            scratch_shapes=[pltpu.VMEM((r, 1), jnp.float32),
                            pltpu.VMEM((r, 1), jnp.float32)],
        ),
        compiler_params=pltpu.CompilerParams(
            dimension_semantics=("parallel", "arbitrary"),
            vmem_limit_bytes=vmem_limit,
        ),
        cost_estimate=pl.CostEstimate(
            flops=3 * rows * hw,
            transcendentals=rows,
            bytes_accessed=rows * hw * itemsize + 8 * rows,
        ),
    )(x2)

    return pl.pallas_call(
        _in_apply_kernel,
        out_shape=jax.ShapeDtypeStruct((rows, hw), x2.dtype),
        grid_spec=pltpu.PrefetchScalarGridSpec(
            num_scalar_prefetch=0,
            grid=(num_i, num_j),
            in_specs=[pl.BlockSpec((r, thw), lambda i, j: (i, j)),
                      pl.BlockSpec((r, 1), lambda i, j: (i, 0)),
                      pl.BlockSpec((r, 1), lambda i, j: (i, 0))],
            out_specs=pl.BlockSpec((r, thw), lambda i, j: (i, j)),
        ),
        compiler_params=pltpu.CompilerParams(
            dimension_semantics=("parallel", "parallel"),
            vmem_limit_bytes=vmem_limit,
        ),
        cost_estimate=pl.CostEstimate(
            flops=2 * rows * hw,
            transcendentals=0,
            bytes_accessed=2 * rows * hw * itemsize + 8 * rows,
        ),
    )(x2, mean, inv_std)


# ---------------------------------------------------------------------------
# Public wrapper: NormalizationLayer(C, norm_type='IN2D') forward.
# ---------------------------------------------------------------------------
def normalization_layer_in2d(x, *, block_f32_bytes=_DEFAULT_BLOCK_F32_BYTES):
    """InstanceNorm2d forward (affine=False, eps=1e-5). x: (N, C, H, W)."""
    n, c, h, w = x.shape
    rows, hw = n * c, h * w
    x2 = x.reshape(rows, hw)
    mult = _sublane_multiple(x.dtype)
    vmem_limit = _vmem_limit_bytes()
    if mult * hw * 4 <= block_f32_bytes:
        out2 = _single_pass(x2, rows, hw, mult, block_f32_bytes, vmem_limit)
    else:
        out2 = _two_pass(x2, rows, hw, mult, block_f32_bytes, vmem_limit)
    return out2.reshape(n, c, h, w)


if __name__ == "__main__":
    key = jax.random.PRNGKey(0)
    N, C, H, W = 2, 4, 16, 16
    x = jax.random.normal(key, (N, C, H, W), dtype=jnp.float32)

    def ref_in2d(a):
        a3 = a.astype(jnp.float32).reshape(a.shape[0], a.shape[1], -1)
        m = jnp.mean(a3, axis=-1, keepdims=True)
        v = jnp.mean((a3 - m) ** 2, axis=-1, keepdims=True)
        return ((a3 - m) * lax.rsqrt(v + EPS)).reshape(a.shape)

    # 1) main single-pass, row-tiled path (f32)
    out = jax.block_until_ready(normalization_layer_in2d(x))
    assert jnp.max(jnp.abs(out - ref_in2d(x))) < 1e-4, "f32 single-pass mismatch"

    # 2) bf16 input (f32 accumulation inside the kernel)
    xb = x.astype(jnp.bfloat16)
    outb = jax.block_until_ready(normalization_layer_in2d(xb))
    assert jnp.max(jnp.abs(outb.astype(jnp.float32) - ref_in2d(xb))) < 5e-2, \
        "bf16 single-pass mismatch"

    # 3) force the large-HW two-pass path on the same small data (tiny budget)
    out2p = jax.block_until_ready(
        normalization_layer_in2d(x, block_f32_bytes=4096))
    assert jnp.max(jnp.abs(out2p - ref_in2d(x))) < 1e-4, "two-pass mismatch"

    print("KERNEL_OK")
</pallas_src>

<mosaic_0001>
module attributes {stable_mosaic.version = 11 : i64} {
  func.func @_in_rows_kernel(%arg0: i32, %arg1: memref<8x256xf32, #tpu.memory_space<vmem>>, %arg2: memref<8x256xf32, #tpu.memory_space<vmem>>) attributes {dimension_semantics = [#tpu.dimension_semantics<parallel>], iteration_bounds = array<i64: 1>, scalar_prefetch = 0 : i64, scratch_operands = 0 : i64, tpu.core_type = #tpu.core_type<tc>, window_params = [{transform_indices = @transform_0, window_bounds = array<i64: 8, 256>}, {transform_indices = @transform_1, window_bounds = array<i64: 8, 256>}]} {
    %c0 = arith.constant 0 : index
    %c0_0 = arith.constant 0 : index
    %0 = vector.load %arg1[%c0, %c0_0] : memref<8x256xf32, #tpu.memory_space<vmem>>, vector<8x256xf32>
    %cst = arith.constant dense<0.000000e+00> : vector<8xf32>
    %1 = vector.multi_reduction <add>, %0, %cst [1] : vector<8x256xf32> to vector<8xf32>
    %2 = vector.shape_cast %1 : vector<8xf32> to vector<8x1xf32>
    %3 = arith.mulf %0, %0 : vector<8x256xf32>
    %cst_1 = arith.constant dense<0.000000e+00> : vector<8xf32>
    %4 = vector.multi_reduction <add>, %3, %cst_1 [1] : vector<8x256xf32> to vector<8xf32>
    %5 = vector.shape_cast %4 : vector<8xf32> to vector<8x1xf32>
    %cst_2 = arith.constant 3.906250e-03 : f32
    %6 = vector.broadcast %cst_2 : f32 to vector<8x1xf32>
    %7 = arith.mulf %2, %6 : vector<8x1xf32>
    %cst_3 = arith.constant 3.906250e-03 : f32
    %8 = vector.broadcast %cst_3 : f32 to vector<8x1xf32>
    %9 = arith.mulf %5, %8 : vector<8x1xf32>
    %10 = arith.mulf %7, %7 : vector<8x1xf32>
    %11 = arith.subf %9, %10 : vector<8x1xf32>
    %cst_4 = arith.constant 0.000000e+00 : f32
    %12 = vector.broadcast %cst_4 : f32 to vector<8x1xf32>
    %13 = arith.maximumf %11, %12 : vector<8x1xf32>
    %cst_5 = arith.constant 9.99999974E-6 : f32
    %14 = vector.broadcast %cst_5 : f32 to vector<8x1xf32>
    %15 = arith.addf %13, %14 : vector<8x1xf32>
    %16 = math.rsqrt %15 : vector<8x1xf32>
    %17 = vector.broadcast %7 : vector<8x1xf32> to vector<8x256xf32>
    %18 = arith.subf %0, %17 : vector<8x256xf32>
    %19 = vector.broadcast %16 : vector<8x1xf32> to vector<8x256xf32>
    %20 = arith.mulf %18, %19 : vector<8x256xf32>
    %c0_6 = arith.constant 0 : index
    %c0_7 = arith.constant 0 : index
    %21 = vector.load %arg2[%c0_6, %c0_7] : memref<8x256xf32, #tpu.memory_space<vmem>>, vector<8x256xf32>
    tpu.vector_store %arg2[%c0_6, %c0_7], %20 {strides = array<i32>} : memref<8x256xf32, #tpu.memory_space<vmem>>, vector<8x256xf32>,
    return
  }
  func.func @transform_0(%arg0: i32) -> (i32, i32) {
    %c0_i32 = arith.constant 0 : i32
    %c0_i32_0 = arith.constant 0 : i32
    return %arg0, %c0_i32 : i32, i32
  }
  func.func @transform_1(%arg0: i32) -> (i32, i32) {
    %c0_i32 = arith.constant 0 : i32
    %c0_i32_0 = arith.constant 0 : i32
    return %arg0, %c0_i32 : i32, i32
  }
}

</mosaic_0001>

<bundles_post_ra>
// kernel: tpu_custom_call.1
= control target key start
LH: loop header
LB: loop body
LE: loop exit
PB: predicated region body
PF: predicated region fallthrough
CT: control target
= control target key end

     0   :  { %6 = vsyncpa [#allocation3], 0  ;;  %s147_s0 = inlined_call_operand.hbm [shape: f32[8,256], index: 0, kind: input, shape index: {}]   ;;  %s148_s1 = inlined_call_operand.hbm [shape: f32[8,256], index: 1, kind: output, shape index: {}]  }
   0x1   :  { %7 = vsyncpa [#allocation4], 0  ;;  %s111_s6 = smov [#allocation2]   ;;  %s63_s10 = scalar_lea.hbm %s147_s0, 256 }
   0x2   :  { %s14_s7 = sshll.u32 %s111_s6, 4  ;;  %p64_p0 = scmp.ne.s32.totalorder %s147_s0, %s63_s10  ;;  %s15_s7 = int_to_ptr.vmem [resolvable:$true] %s14_s7 }
   0x3   :  { %p67_p1 = scmp.lt.u32.totalorder %s63_s10, %s147_s0 }
   0x5   :  { %p69_p2 = pnand %p67_p1, %p64_p0 }
   0x7   :  { %72 = shalt.err (!%p69_p2)
}
   0x8   :  { %s73_s15 = scalar_lea.vmem %s15_s7, 256  ;;  %p78_p4 = scmp.lt.s32.totalorder %s15_s7, %s15_s7 }
   0x9   :  { %p74_p3 = scmp.ne.s32.totalorder %s15_s7, %s73_s15  ;;  %p79_p5 = scmp.lt.s32.totalorder %s73_s15, %s73_s15 }
   0xb   :  { %p80_p6 = por %p79_p5, %p78_p4 }
   0xd   :  { %p81_p7 = pnand %p80_p6, %p74_p3 }
   0xf   :  { %84 = shalt.err (!%p81_p7)
}
  0x10   :  { %17 = dma.hbm_to_vmem [thread:$0]  %s147_s0, 256, %s15_s7, [#allocation3]  }
  0x11   :  { %107 = dma.done.wait [#allocation3], 256  }
  0x12   :  { %108 = vsyncadd [#allocation3], 4294967040  ;;  %v21_v0 = vld [vmem:[#allocation2] sm:$0xff]  ;;  %v22_v1 = vld [vmem:[#allocation2 + $0x8] sm:$0xff]  ;;  %s112_s0 = smov [#allocation5]  }
  0x13   :  { %v23_v2 = vadd.f32 %v22_v1, %v21_v0  ;;  %v26_v3 = vmul.f32 %v21_v0, %v21_v0  ;;  %v27_v4 = vmul.f32 %v22_v1, %v22_v1  ;;  %s50_s18 = sshll.u32 %s112_s0, 4  ;;  %s51_s18 = int_to_ptr.vmem [resolvable:$true] %s50_s18 }
  0x14   :  { %s85_s19 = scalar_lea.vmem %s51_s18, 256  ;;  %p90_p9 = scmp.lt.s32.totalorder %s51_s18, %s51_s18 }
  0x15   :  { %24 = vadd.xlane.f32.xlu0 %v23_v2  ;;  %v28_v5 = vadd.f32 %v27_v4, %v26_v3  ;;  %p86_p8 = scmp.ne.s32.totalorder %s51_s18, %s85_s19  ;;  %p91_p10 = scmp.lt.s32.totalorder %s85_s19, %s85_s19 }
  0x17   :  { %p92_p11 = por %p91_p10, %p90_p9 }
  0x19   :  { %29 = vadd.xlane.f32.xlu0 %v28_v5  ;;  %p93_p12 = pnand %p92_p11, %p86_p8 }
  0xa2   :  { %v25_v6 = vpop.xlane.xlu0 %24 }
  0xa3   :  { %v31_v7 = vmul.f32 0.00390625, %v25_v6 }
  0xa5   :  { %v33_v9 = vmul.f32 %v31_v7, %v31_v7  ;;  %v38_v14 = vsub.f32 %v21_v0, %v31_v7  ;;  %v39_v15 = vsub.f32 %v22_v1, %v31_v7 }
  0xa6   :  { %v30_v8 = vpop.xlane.xlu0 %29 }
  0xa7   :  { %v32_v10 = vmul.f32 0.00390625, %v30_v8 }
  0xa9   :  { %v34_v11 = vsub.f32 %v32_v10, %v33_v9 }
  0xab   :  { %v35_v12 = vmax.f32 %v34_v11, 0.0 }
  0xad   :  { %v36_v13 = vadd.f32 1e-05, %v35_v12 }
  0xaf   :  { %61 = vrsqrt.f32 %v36_v13 }
  0xb9   :  { %v62_v16 = vpop.eup %61 }
  0xba   :  { %v40_v17 = vmul.f32 %v62_v16, %v38_v14  ;;  %v41_v18 = vmul.f32 %v62_v16, %v39_v15 }
  0xbc   :  { %42 = vst [vmem:[#allocation5] sm:$0xff] %v40_v17  ;;  %43 = vst [vmem:[#allocation5 + $0x8] sm:$0xff] %v41_v18 }
  0xbd   :  { %96 = shalt.err (!%p93_p12)
}
  0xbe   :  { %s97_s22 = scalar_lea.hbm %s148_s1, 256 }
  0xbf   :  { %p98_p13 = scmp.ne.s32.totalorder %s148_s1, %s97_s22  ;;  %p101_p0 = scmp.lt.u32.totalorder %s97_s22, %s148_s1 }
  0xc1   :  { %p103_p1 = pnand %p101_p0, %p98_p13 }
  0xc3   :  { %106 = shalt.err (!%p103_p1)
}
  0xc4   :  { %53 = dma.vmem_to_hbm [thread:$0]  %s51_s18, 256, %s148_s1, [#allocation4]  }
  0xc5   :  { %109 = dma.done.wait [#allocation4], 256  }
  0xc6   :  { %110 = vsyncadd [#allocation4], 4294967040 }
  0xc7   :  { %57 = vsyncpa [#allocation3], 1 }
  0xc8   :  { %58 = vsyncpa [#allocation4], 1 }

</bundles_post_ra>
